<compile_context>
chip_gen: v7x
topology: tpu7x:2x2x1
jax: 0.10.0
libtpu: 0.0.40
codegen_flags: <defaults>
</compile_context>

<pallas_src>
import functools

import jax
import jax.numpy as jnp
from jax.experimental import pallas as pl
from jax.experimental.pallas import tpu as pltpu

KERNEL_SIZE = 5
PAD = KERNEL_SIZE // 2
POOL = 2                 # MaxPool2d(2)
NUM_CLASSES = 49
NOUT = 128               # lane-dense padded class dim (49 -> 128)
LANE = 128


def _round_up(x, m):
    return (x + m - 1) // m * m


def _supports_bf16_vpu():
    """bf16 VALUs exist on v6e / v7x; keep f32 pooling on v5e and older."""
    try:
        kind = jax.devices()[0].device_kind.lower()
    except Exception:
        return True
    return not any(tag in kind for tag in ("v2", "v3", "v4", "v5"))


def _patch_kernel(x_ref, wconv_ref, wlin_ref, out_ref, *, pool_in_bf16):
    """Fused conv(+bias) -> ReLU -> maxpool -> linear for one M-tile.

    x_ref:     (PH, TM, Kp)        bf16  im2col'ed 2-row strips (bias lane = 1.0)
    wconv_ref: (Kp, 16*hid)        bf16  conv matmul weight, out lanes (dh, dw, pw, c)
                                          (row K_raw holds the tiled conv bias)
    wlin_ref:  (PH, PW*hid, NOUT)  bf16  linear weight blocks (rows = (pw, c))
    out_ref:   (TM, NOUT)          f32   lane-dense logits (classes padded to 128)
    """
    ph_blocks, tm, kp = x_ref.shape
    hid16 = wconv_ref.shape[1]
    hid8 = hid16 // 2
    hid4 = hid8 // 2
    nout = out_ref.shape[1]

    # ---- Conv2d(k=5, pad=2) + bias for a 2-row output strip: ONE matmul ----
    x = x_ref[...].reshape(ph_blocks * tm, kp)          # merge leading dims (cheap)
    conv = jnp.dot(x, wconv_ref[...], preferred_element_type=jnp.float32)
    conv = jnp.maximum(conv, 0.0)                       # ReLU (bias rode the matmul)

    # ---- MaxPool2d(2): window positions live in vreg-aligned lane halves ----
    if pool_in_bf16:
        conv = conv.astype(jnp.bfloat16)                # halve live intermediate (v6e/v7x)
    p = jnp.maximum(conv[:, :hid8], conv[:, hid8:])     # max over h-parity
    p = jnp.maximum(p[:, :hid4], p[:, hid4:])           # max over w-parity
    p = p.astype(jnp.bfloat16)                          # (PH*TM, PW*hid), lanes (pw, c)

    # ---- Linear(hid*16 -> 49): PH accumulated K=PW*hid matmuls, no relayout ----
    acc = jnp.zeros((tm, nout), jnp.float32)
    for ph in range(ph_blocks):
        acc = acc + jnp.dot(p[ph * tm:(ph + 1) * tm, :], wlin_ref[ph],
                            preferred_element_type=jnp.float32)
    out_ref[...] = acc


def patch_model_forward(x, w_conv, b_conv, w_lin, *, tile_m=512):
    """x: (B, N, C, 8, 8) PyTorch-style patches.
    w_conv: (hid, C, 5, 5)   b_conv: (hid,)   w_lin: (49, hid*16)."""
    B, N, C, H, W = x.shape
    assert H == 8 and W == 8, "PatchModel's Linear(hid*4*4) implies 8x8 patches"
    hid = w_conv.shape[0]
    assert hid % 32 == 0, "hid_c must be a multiple of 32 (128-lane alignment of 4*hid)"
    M = B * N
    PH, PW = H // POOL, W // POOL                      # 4, 4
    Wp = W + 2 * PAD                                   # 12
    STRIP = POOL + KERNEL_SIZE - 1                     # 6 padded rows per 2-row strip
    HID16 = POOL * POOL * PW * hid

    # ---------- M tiling: multiple of 8, big tiles, grid >= 2 when M permits ----------
    M8 = _round_up(M, 8)
    TM = min(_round_up(tile_m, 8), M8)
    if M8 >= 16:                                       # keep both v7x TensorCores busy
        TM = min(TM, _round_up(pl.cdiv(M8, 2), 8))
    Mp = _round_up(M, TM)

    # ---------- activation im2col (bf16 end-to-end): rows (ph, m), K = (dh, col, c) ----------
    x_bf = x.reshape(M, C, H, W).astype(jnp.bfloat16)
    x_nhwc = jnp.transpose(x_bf, (0, 2, 3, 1))                       # (M, H, W, C)
    x_pad = jnp.pad(x_nhwc, ((0, 0), (PAD, PAD), (PAD, PAD), (0, 0)))
    K_raw = STRIP * Wp * C
    Kp = max(LANE, _round_up(K_raw + 1, LANE))                       # +1 bias lane
    row_idx = POOL * jnp.arange(PH)[:, None] + jnp.arange(STRIP)[None, :]
    x_im = x_pad[:, row_idx, :, :]                                   # (M, PH, STRIP, Wp, C)
    x_im = jnp.transpose(x_im, (1, 0, 2, 3, 4)).reshape(PH, M, K_raw)
    x_im = jnp.pad(x_im, ((0, 0), (0, Mp - M), (0, Kp - K_raw)))
    x_im = x_im.at[:, :, K_raw].set(1.0)                             # bias lane = 1.0

    # ---------- conv weight -> (Kp, 16*hid), out lanes (dh2, dw, pw, c_out); bias folded ----------
    wt = jnp.transpose(w_conv, (2, 3, 1, 0))            # (kh, kw, c_in, c_out)
    T = jnp.zeros((STRIP, Wp, C, POOL, POOL, PW, hid), jnp.float32)
    for dh2 in range(POOL):
        for w in range(W):                              # output column w = 2*pw + dw
            pw, dw = divmod(w, POOL)
            T = T.at[dh2:dh2 + KERNEL_SIZE, w:w + KERNEL_SIZE, :, dh2, dw, pw, :].set(wt)
    w_conv_mat = T.reshape(K_raw, HID16)
    bias_row = jnp.tile(b_conv.astype(jnp.float32), POOL * POOL * PW).reshape(1, HID16)
    w_conv_mat = jnp.concatenate([w_conv_mat, bias_row], axis=0)     # row K_raw = bias
    w_conv_mat = jnp.pad(w_conv_mat, ((0, Kp - (K_raw + 1)), (0, 0))).astype(jnp.bfloat16)

    # ---------- linear weight -> (PH, PW*hid, NOUT): PyTorch flatten order (c, ph, pw) ----------
    wl = jnp.transpose(w_lin.reshape(NUM_CLASSES, hid, PH, PW), (2, 3, 1, 0))
    wl = wl.reshape(PH, PW * hid, NUM_CLASSES)
    wl = jnp.pad(wl, ((0, 0), (0, 0), (0, NOUT - NUM_CLASSES))).astype(jnp.bfloat16)

    kernel = functools.partial(_patch_kernel, pool_in_bf16=_supports_bf16_vpu())

    out = pl.pallas_call(
        kernel,
        out_shape=jax.ShapeDtypeStruct((Mp, NOUT), jnp.float32),
        grid=(Mp // TM,),
        in_specs=[
            pl.BlockSpec((PH, TM, Kp), lambda i: (0, i, 0)),
            pl.BlockSpec((Kp, HID16), lambda i: (0, 0)),
            pl.BlockSpec((PH, PW * hid, NOUT), lambda i: (0, 0, 0)),
        ],
        out_specs=pl.BlockSpec((TM, NOUT), lambda i: (i, 0)),
        compiler_params=pltpu.CompilerParams(
            dimension_semantics=("parallel",),
            vmem_limit_bytes=32 * 1024 * 1024,
        ),
    )(x_im, w_conv_mat, wl)

    return out[:M, :NUM_CLASSES].reshape(B, N, NUM_CLASSES)


def reference_forward(x, w_conv, b_conv, w_lin):
    """Pure-JAX reference with PyTorch semantics (NCHW, f32 highest precision)."""
    B, N, C, H, W = x.shape
    hid = w_conv.shape[0]
    xm = x.reshape(B * N, C, H, W)
    y = jax.lax.conv_general_dilated(
        xm, w_conv, window_strides=(1, 1),
        padding=((PAD, PAD), (PAD, PAD)),
        dimension_numbers=("NCHW", "OIHW", "NCHW"),
        precision=jax.lax.Precision.HIGHEST)
    y = jnp.maximum(y + b_conv[None, :, None, None], 0.0)
    y = y.reshape(B * N, hid, H // 2, 2, W // 2, 2).max(axis=(3, 5))
    feats = y.reshape(B * N, -1)
    logits = jnp.dot(feats, w_lin.T, precision=jax.lax.Precision.HIGHEST)
    return logits.reshape(B, N, -1)


if __name__ == "__main__":
    B, N, in_c, hid_c, H, W = 2, 4, 3, 64, 8, 8   # H=W=8 -> pooled 4x4 (matches Linear)

    key = jax.random.PRNGKey(0)
    kx, kw1, kw2 = jax.random.split(key, 3)
    x = jax.random.normal(kx, (B, N, in_c, H, W), jnp.float32)

    # Deterministic kaiming_normal_(mode='fan_out', nonlinearity='relu'): std = sqrt(2/fan_out)
    fan_out_conv = hid_c * KERNEL_SIZE * KERNEL_SIZE
    w_conv = jax.random.normal(
        kw1, (hid_c, in_c, KERNEL_SIZE, KERNEL_SIZE), jnp.float32
    ) * jnp.sqrt(2.0 / fan_out_conv)
    b_conv = jnp.zeros((hid_c,), jnp.float32)          # nn.init.constant_(bias, 0)
    w_lin = jax.random.normal(
        kw2, (NUM_CLASSES, hid_c * 4 * 4), jnp.float32
    ) * jnp.sqrt(2.0 / NUM_CLASSES)

    out = jax.jit(patch_model_forward)(x, w_conv, b_conv, w_lin)
    out = jax.block_until_ready(out)

    assert out.shape == (B, N, NUM_CLASSES), out.shape
    ref = reference_forward(x, w_conv, b_conv, w_lin)
    # bf16 matmul inputs with f32 accumulation: ~1% relative error expected.
    if not jnp.allclose(out, ref, atol=5e-2, rtol=2e-2):
        raise AssertionError(
            f"kernel/reference mismatch, max abs err = {jnp.max(jnp.abs(out - ref))}")

    print("KERNEL_OK")
</pallas_src>

<mosaic_0001>
module attributes {stable_mosaic.version = 11 : i64} {
  func.func @_patch_kernel(%arg0: i32, %arg1: memref<4x8x256xbf16, #tpu.memory_space<vmem>>, %arg2: memref<256x1024xbf16, #tpu.memory_space<vmem>>, %arg3: memref<4x256x128xbf16, #tpu.memory_space<vmem>>, %arg4: memref<8x128xf32, #tpu.memory_space<vmem>>) attributes {dimension_semantics = [#tpu.dimension_semantics<parallel>], iteration_bounds = array<i64: 1>, scalar_prefetch = 0 : i64, scratch_operands = 0 : i64, tpu.core_type = #tpu.core_type<tc>, window_params = [{transform_indices = @transform_0, window_bounds = array<i64: 4, 8, 256>}, {pipeline_mode = #tpu.pipeline_mode<synchronous>, transform_indices = @transform_1, window_bounds = array<i64: 256, 1024>}, {pipeline_mode = #tpu.pipeline_mode<synchronous>, transform_indices = @transform_2, window_bounds = array<i64: 4, 256, 128>}, {transform_indices = @transform_3, window_bounds = array<i64: 8, 128>}]} {
    %c0 = arith.constant 0 : index
    %c0_0 = arith.constant 0 : index
    %c0_1 = arith.constant 0 : index
    %0 = vector.load %arg1[%c0, %c0_0, %c0_1] : memref<4x8x256xbf16, #tpu.memory_space<vmem>>, vector<4x8x256xbf16>
    %1 = vector.shape_cast %0 : vector<4x8x256xbf16> to vector<32x256xbf16>
    %c0_2 = arith.constant 0 : index
    %c0_3 = arith.constant 0 : index
    %2 = vector.load %arg2[%c0_2, %c0_3] : memref<256x1024xbf16, #tpu.memory_space<vmem>>, vector<256x1024xbf16>
    %cst = arith.constant dense<0.000000e+00> : vector<32x1024xf32>
    %3 = tpu.matmul %1, %2, %cst {dimension_numbers = #tpu.dot_dimension_numbers<[1], [0], [0], [1], [0, 0, 1, 1], [], []>} : vector<32x256xbf16>, vector<256x1024xbf16>, vector<32x1024xf32> -> vector<32x1024xf32>
    %cst_4 = arith.constant 0.000000e+00 : f32
    %4 = vector.broadcast %cst_4 : f32 to vector<32x1024xf32>
    %5 = arith.maximumf %3, %4 : vector<32x1024xf32>
    %6 = arith.truncf %5 : vector<32x1024xf32> to vector<32x1024xbf16>
    %7 = vector.extract_strided_slice %6 {offsets = [0, 0], sizes = [32, 512], strides = [1, 1]} : vector<32x1024xbf16> to vector<32x512xbf16>
    %8 = vector.extract_strided_slice %6 {offsets = [0, 512], sizes = [32, 512], strides = [1, 1]} : vector<32x1024xbf16> to vector<32x512xbf16>
    %9 = arith.maximumf %7, %8 : vector<32x512xbf16>
    %10 = vector.extract_strided_slice %9 {offsets = [0, 0], sizes = [32, 256], strides = [1, 1]} : vector<32x512xbf16> to vector<32x256xbf16>
    %11 = vector.extract_strided_slice %9 {offsets = [0, 256], sizes = [32, 256], strides = [1, 1]} : vector<32x512xbf16> to vector<32x256xbf16>
    %12 = arith.maximumf %10, %11 : vector<32x256xbf16>
    %cst_5 = arith.constant 0.000000e+00 : f32
    %13 = vector.broadcast %cst_5 : f32 to vector<8x128xf32>
    %14 = vector.extract_strided_slice %12 {offsets = [0, 0], sizes = [8, 256], strides = [1, 1]} : vector<32x256xbf16> to vector<8x256xbf16>
    %c0_6 = arith.constant 0 : index
    %c0_7 = arith.constant 0 : index
    %c0_8 = arith.constant 0 : index
    %15 = vector.load %arg3[%c0_6, %c0_7, %c0_8] : memref<4x256x128xbf16, #tpu.memory_space<vmem>>, vector<1x256x128xbf16>
    %16 = vector.shape_cast %15 : vector<1x256x128xbf16> to vector<256x128xbf16>
    %cst_9 = arith.constant dense<0.000000e+00> : vector<8x128xf32>
    %17 = tpu.matmul %14, %16, %cst_9 {dimension_numbers = #tpu.dot_dimension_numbers<[1], [0], [0], [1], [0, 0, 1, 1], [], []>} : vector<8x256xbf16>, vector<256x128xbf16>, vector<8x128xf32> -> vector<8x128xf32>
    %18 = arith.addf %13, %17 : vector<8x128xf32>
    %19 = vector.extract_strided_slice %12 {offsets = [8, 0], sizes = [8, 256], strides = [1, 1]} : vector<32x256xbf16> to vector<8x256xbf16>
    %c1 = arith.constant 1 : index
    %c0_10 = arith.constant 0 : index
    %c0_11 = arith.constant 0 : index
    %20 = vector.load %arg3[%c1, %c0_10, %c0_11] : memref<4x256x128xbf16, #tpu.memory_space<vmem>>, vector<1x256x128xbf16>
    %21 = vector.shape_cast %20 : vector<1x256x128xbf16> to vector<256x128xbf16>
    %cst_12 = arith.constant dense<0.000000e+00> : vector<8x128xf32>
    %22 = tpu.matmul %19, %21, %cst_12 {dimension_numbers = #tpu.dot_dimension_numbers<[1], [0], [0], [1], [0, 0, 1, 1], [], []>} : vector<8x256xbf16>, vector<256x128xbf16>, vector<8x128xf32> -> vector<8x128xf32>
    %23 = arith.addf %18, %22 : vector<8x128xf32>
    %24 = vector.extract_strided_slice %12 {offsets = [16, 0], sizes = [8, 256], strides = [1, 1]} : vector<32x256xbf16> to vector<8x256xbf16>
    %c2 = arith.constant 2 : index
    %c0_13 = arith.constant 0 : index
    %c0_14 = arith.constant 0 : index
    %25 = vector.load %arg3[%c2, %c0_13, %c0_14] : memref<4x256x128xbf16, #tpu.memory_space<vmem>>, vector<1x256x128xbf16>
    %26 = vector.shape_cast %25 : vector<1x256x128xbf16> to vector<256x128xbf16>
    %cst_15 = arith.constant dense<0.000000e+00> : vector<8x128xf32>
    %27 = tpu.matmul %24, %26, %cst_15 {dimension_numbers = #tpu.dot_dimension_numbers<[1], [0], [0], [1], [0, 0, 1, 1], [], []>} : vector<8x256xbf16>, vector<256x128xbf16>, vector<8x128xf32> -> vector<8x128xf32>
    %28 = arith.addf %23, %27 : vector<8x128xf32>
    %29 = vector.extract_strided_slice %12 {offsets = [24, 0], sizes = [8, 256], strides = [1, 1]} : vector<32x256xbf16> to vector<8x256xbf16>
    %c3 = arith.constant 3 : index
    %c0_16 = arith.constant 0 : index
    %c0_17 = arith.constant 0 : index
    %30 = vector.load %arg3[%c3, %c0_16, %c0_17] : memref<4x256x128xbf16, #tpu.memory_space<vmem>>, vector<1x256x128xbf16>
    %31 = vector.shape_cast %30 : vector<1x256x128xbf16> to vector<256x128xbf16>
    %cst_18 = arith.constant dense<0.000000e+00> : vector<8x128xf32>
    %32 = tpu.matmul %29, %31, %cst_18 {dimension_numbers = #tpu.dot_dimension_numbers<[1], [0], [0], [1], [0, 0, 1, 1], [], []>} : vector<8x256xbf16>, vector<256x128xbf16>, vector<8x128xf32> -> vector<8x128xf32>
    %33 = arith.addf %28, %32 : vector<8x128xf32>
    %c0_19 = arith.constant 0 : index
    %c0_20 = arith.constant 0 : index
    %34 = vector.load %arg4[%c0_19, %c0_20] : memref<8x128xf32, #tpu.memory_space<vmem>>, vector<8x128xf32>
    tpu.vector_store %arg4[%c0_19, %c0_20], %33 {strides = array<i32>} : memref<8x128xf32, #tpu.memory_space<vmem>>, vector<8x128xf32>,
    return
  }
  func.func @transform_0(%arg0: i32) -> (i32, i32, i32) {
    %c0_i32 = arith.constant 0 : i32
    %c0_i32_0 = arith.constant 0 : i32
    %c0_i32_1 = arith.constant 0 : i32
    return %c0_i32, %arg0, %c0_i32_0 : i32, i32, i32
  }
  func.func @transform_1(%arg0: i32) -> (i32, i32) {
    %c0_i32 = arith.constant 0 : i32
    %c0_i32_0 = arith.constant 0 : i32
    %c0_i32_1 = arith.constant 0 : i32
    return %c0_i32, %c0_i32_0 : i32, i32
  }
  func.func @transform_2(%arg0: i32) -> (i32, i32, i32) {
    %c0_i32 = arith.constant 0 : i32
    %c0_i32_0 = arith.constant 0 : i32
    %c0_i32_1 = arith.constant 0 : i32
    %c0_i32_2 = arith.constant 0 : i32
    return %c0_i32, %c0_i32_0, %c0_i32_1 : i32, i32, i32
  }
  func.func @transform_3(%arg0: i32) -> (i32, i32) {
    %c0_i32 = arith.constant 0 : i32
    %c0_i32_0 = arith.constant 0 : i32
    return %arg0, %c0_i32 : i32, i32
  }
}

</mosaic_0001>

<bundles_post_ra>
// kernel: tile.0
= control target key start
LH: loop header
LB: loop body
LE: loop exit
PB: predicated region body
PF: predicated region fallthrough
CT: control target
= control target key end

     0   :  { %vm34_vm0 = vcmask 523264   ;;  %vm41_vm1 = vcmask 1048064   ;;  %v121_v9 = vmov 0.0   ;;  %s159_s0 = inlined_call_operand.vmem [shape: bf16[16,64], index: 0, kind: input, shape index: {}]   ;;  %s160_s1 = inlined_call_operand.vmem [shape: bf16[1,1024], index: 1, kind: output, shape index: {}]  }
   0x1   :  { %v115_v0 = vld [vmem:[%s159_s0] sm:$0xff]   ;;  %s120_s0 = smov 64  }
   0x2   :  { %v116_v1 = vunpack.c.l.bf16 %v115_v0  ;;  %v117_v2 = vunpack.c.h.bf16 %v115_v0 }
   0x4   :  { %19 = vst [vmem:[#allocation1 + $0x8] sm:$0xff] %v117_v2  ;;  %32 = vst [vmem:[#allocation1] sm:$0xff] %v116_v1 }
   0xb   :  { %v38_v3 = vld [vmem:[#allocation1 + $0x1] ss:$2 sm:$0xff]   ;;  %v33_v4 = vld [vmem:[#allocation1] ss:$2 sm:$0xff]  }
   0xc   :  { %39 = vrot.lane.b32.xlu0 %v38_v3, %s120_s0  ;;  %35 = vst.msk [vmem:[#allocation0] ss:$8 sm:$0xf] %vm34_vm0, %v33_v4   ;;  %36 = vst.msk [vmem:[#allocation0] ss:$8 sm:$0xf0] %vm34_vm0, %v33_v4  }
  0x7e   :  { %v40_v5 = vpop.permute.xlu0 %39  }
  0x7f   :  { %42 = vst.msk [vmem:[#allocation0] ss:$8 sm:$0xf] %vm41_vm1, %v40_v5   ;;  %43 = vst.msk [vmem:[#allocation0] ss:$8 sm:$0xf0] %vm41_vm1, %v40_v5  }
  0x86   :  { %v48_v6 = vld [vmem:[#allocation0] sm:$0x3]  ;;  %v53_v7 = vld [vmem:[#allocation0 + $0x8] sm:$0x3]  ;;  %v59_v8 = vld [vmem:[#allocation0 + $0x10] sm:$0x3] }
  0x87   :  { %v49_v10 = vpack.c.bf16 %v121_v9, %v48_v6  ;;  %v54_v11 = vpack.c.bf16 %v121_v9, %v53_v7  ;;  %v60_v12 = vpack.c.bf16 %v121_v9, %v59_v8  ;;  %v66_v13 = vld [vmem:[#allocation0 + $0x18] sm:$0x3]  ;;  %v73_v14 = vld [vmem:[#allocation0 + $0x20] sm:$0x3]  ;;  %v80_v15 = vld [vmem:[#allocation0 + $0x28] sm:$0x3] }
  0x88   :  { %v67_v16 = vpack.c.bf16 %v121_v9, %v66_v13  ;;  %v74_v17 = vpack.c.bf16 %v121_v9, %v73_v14  ;;  %v81_v18 = vpack.c.bf16 %v121_v9, %v80_v15  ;;  %v87_v19 = vld [vmem:[#allocation0 + $0x30] sm:$0x3]  ;;  %v94_v20 = vld [vmem:[#allocation0 + $0x38] sm:$0x3] }
  0x89   :  { %51 = vst [vmem:[%s160_s1] sm:$0x1] %v49_v10  ;;  %107 = vst [vmem:[%s160_s1 + $0x1] sm:$0x1] %v54_v11  ;;  %v88_v21 = vpack.c.bf16 %v121_v9, %v87_v19  ;;  %v95_v22 = vpack.c.bf16 %v121_v9, %v94_v20 }
  0x8a   :  { %108 = vst [vmem:[%s160_s1 + $0x2] sm:$0x1] %v60_v12  ;;  %109 = vst [vmem:[%s160_s1 + $0x3] sm:$0x1] %v67_v16 }
  0x8b   :  { %110 = vst [vmem:[%s160_s1 + $0x4] sm:$0x1] %v74_v17  ;;  %111 = vst [vmem:[%s160_s1 + $0x5] sm:$0x1] %v81_v18 }
  0x8c   :  { %112 = vst [vmem:[%s160_s1 + $0x6] sm:$0x1] %v88_v21  ;;  %113 = vst [vmem:[%s160_s1 + $0x7] sm:$0x1] %v95_v22 }

// kernel: patch_model_forward.1
= control target key start
LH: loop header
LB: loop body
LE: loop exit
PB: predicated region body
PF: predicated region fallthrough
CT: control target
= control target key end

     0   :  { %s2916_s0 = inlined_call_operand.vmem [shape: bf16[4,8,256], index: 0, kind: input, shape index: {}]   ;;  %s2917_s1 = inlined_call_operand.vmem [shape: bf16[256,1024], index: 1, kind: input, shape index: {}]   ;;  %s2918_s2 = inlined_call_operand.vmem [shape: bf16[4,256,128], index: 2, kind: input, shape index: {}]   ;;  %s2919_s3 = inlined_call_operand.hbm [shape: f32[8,128], index: 3, kind: output, shape index: {}]  }
   0x1   :  { %v20_v0 = vld [vmem:[%s2917_s1] sm:$0xff]  ;;  %v21_v2 = vld [vmem:[%s2917_s1 + $0x8] sm:$0xff] }
   0x2   :  { %v24_v1 = vld [vmem:[%s2917_s1 + $0x20] sm:$0xff]  ;;  %v25_v4 = vld [vmem:[%s2917_s1 + $0x28] sm:$0xff] }
   0x3   :  { %v1789_v3 = vcombine.high %v20_v0, %v24_v1  ;;  %v1788_v5 = vcombine.low %v20_v0, %v24_v1  ;;  %v28_v6 = vld [vmem:[%s2917_s1 + $0x40] sm:$0xff]  ;;  %v1791_v8 = vcombine.high %v21_v2, %v25_v4  ;;  %v1790_v9 = vcombine.low %v21_v2, %v25_v4  ;;  %v29_v11 = vld [vmem:[%s2917_s1 + $0x48] sm:$0xff] }
   0x4   :  { %v32_v7 = vld [vmem:[%s2917_s1 + $0x60] sm:$0xff]  ;;  %v33_v12 = vld [vmem:[%s2917_s1 + $0x68] sm:$0xff] }
   0x5   :  { %v1797_v10 = vcombine.high %v28_v6, %v32_v7  ;;  %v36_v13 = vld [vmem:[%s2917_s1 + $0x80] sm:$0xff]  ;;  %808 = vmatprep.subr.bf16.mxu0 %v1789_v3  ;;  %v1799_v14 = vcombine.high %v29_v11, %v33_v12  ;;  %v37_v16 = vld [vmem:[%s2917_s1 + $0x88] sm:$0xff]  ;;  %861 = vmatprep.subr.bf16.mxu1 %v1791_v8  ;;  %v1796_v18 = vcombine.low %v28_v6, %v32_v7 }
   0x6   :  { %v40_v15 = vld [vmem:[%s2917_s1 + $0xa0] sm:$0xff]  ;;  %v41_v17 = vld [vmem:[%s2917_s1 + $0xa8] sm:$0xff]  ;;  %809 = vmatpush1.bf16.msra.mxu0 %v1788_v5  ;;  %862 = vmatpush1.bf16.msra.mxu1 %v1790_v9  ;;  %v1798_v19 = vcombine.low %v29_v11, %v33_v12 }
   0x7   :  { %810 = vmatprep.subr.bf16.mxu0 %v1797_v10  ;;  %v1805_v20 = vcombine.high %v36_v13, %v40_v15  ;;  %863 = vmatprep.subr.bf16.mxu1 %v1799_v14  ;;  %v1807_v21 = vcombine.high %v37_v16, %v41_v17  ;;  %v44_v22 = vld [vmem:[%s2917_s1 + $0xc0] sm:$0xff]  ;;  %v45_v24 = vld [vmem:[%s2917_s1 + $0xc8] sm:$0xff]  ;;  %v1804_v26 = vcombine.low %v36_v13, %v40_v15 }
   0x8   :  { %v48_v23 = vld [vmem:[%s2917_s1 + $0xe0] sm:$0xff]  ;;  %v49_v25 = vld [vmem:[%s2917_s1 + $0xe8] sm:$0xff]  ;;  %v1806_v27 = vcombine.low %v37_v16, %v41_v17 }
   0x9   :  { %v1813_v28 = vcombine.high %v44_v22, %v48_v23  ;;  %v1815_v29 = vcombine.high %v45_v24, %v49_v25  ;;  %v52_v30 = vld [vmem:[%s2917_s1 + $0x100] sm:$0xff]  ;;  %v53_v32 = vld [vmem:[%s2917_s1 + $0x108] sm:$0xff]  ;;  %v1812_v34 = vcombine.low %v44_v22, %v48_v23  ;;  %v1814_v35 = vcombine.low %v45_v24, %v49_v25 }
   0xa   :  { %811 = vmatpush1.bf16.msra.mxu0 %v1796_v18  ;;  %864 = vmatpush1.bf16.msra.mxu1 %v1798_v19  ;;  %v56_v31 = vld [vmem:[%s2917_s1 + $0x120] sm:$0xff]  ;;  %v57_v33 = vld [vmem:[%s2917_s1 + $0x128] sm:$0xff] }
   0xb   :  { %812 = vmatprep.subr.bf16.mxu0 %v1805_v20  ;;  %865 = vmatprep.subr.bf16.mxu1 %v1807_v21  ;;  %v1821_v36 = vcombine.high %v52_v30, %v56_v31  ;;  %v1823_v37 = vcombine.high %v53_v32, %v57_v33  ;;  %v60_v38 = vld [vmem:[%s2917_s1 + $0x140] sm:$0xff]  ;;  %v61_v40 = vld [vmem:[%s2917_s1 + $0x148] sm:$0xff]  ;;  %v1820_v42 = vcombine.low %v52_v30, %v56_v31 }
   0xc   :  { %v64_v39 = vld [vmem:[%s2917_s1 + $0x160] sm:$0xff]  ;;  %v65_v41 = vld [vmem:[%s2917_s1 + $0x168] sm:$0xff]  ;;  %v1822_v43 = vcombine.low %v53_v32, %v57_v33 }
   0xd   :  { %v1829_v44 = vcombine.high %v60_v38, %v64_v39  ;;  %v1831_v45 = vcombine.high %v61_v40, %v65_v41  ;;  %v68_v46 = vld [vmem:[%s2917_s1 + $0x180] sm:$0xff]  ;;  %v69_v48 = vld [vmem:[%s2917_s1 + $0x188] sm:$0xff]  ;;  %v1828_v50 = vcombine.low %v60_v38, %v64_v39  ;;  %v1830_v51 = vcombine.low %v61_v40, %v65_v41 }
   0xe   :  { %813 = vmatpush1.bf16.msra.mxu0 %v1804_v26  ;;  %866 = vmatpush1.bf16.msra.mxu1 %v1806_v27  ;;  %v72_v47 = vld [vmem:[%s2917_s1 + $0x1a0] sm:$0xff]  ;;  %v73_v49 = vld [vmem:[%s2917_s1 + $0x1a8] sm:$0xff] }
   0xf   :  { %814 = vmatprep.subr.bf16.mxu0 %v1813_v28  ;;  %867 = vmatprep.subr.bf16.mxu1 %v1815_v29  ;;  %v1837_v52 = vcombine.high %v68_v46, %v72_v47  ;;  %v1839_v53 = vcombine.high %v69_v48, %v73_v49  ;;  %v76_v54 = vld [vmem:[%s2917_s1 + $0x1c0] sm:$0xff]  ;;  %v77_v57 = vld [vmem:[%s2917_s1 + $0x1c8] sm:$0xff]  ;;  %v1836_v59 = vcombine.low %v68_v46, %v72_v47 }
  0x10   :  { %v80_v55 = vld [vmem:[%s2917_s1 + $0x1e0] sm:$0xff]  ;;  %v81_v58 = vld [vmem:[%s2917_s1 + $0x1e8] sm:$0xff]  ;;  %v1838_v60 = vcombine.low %v69_v48, %v73_v49 }
  0x11   :  { %v2373_v56 = vld [vmem:[%s2916_s0 + $0x4] ss:$8 sps:$4 sm:$0xff]   ;;  %v1845_v61 = vcombine.high %v76_v54, %v80_v55  ;;  %v1847_v62 = vcombine.high %v77_v57, %v81_v58  ;;  %v1844_v3 = vcombine.low %v76_v54, %v80_v55  ;;  %v1846_v4 = vcombine.low %v77_v57, %v81_v58 }
  0x12   :  { %815 = vmatpush1.bf16.msra.mxu0 %v1812_v34  ;;  %868 = vmatpush1.bf16.msra.mxu1 %v1814_v35  ;;  %v84_v63 = vld [vmem:[%s2917_s1 + $0x200] sm:$0xff]  ;;  %v85_v1 = vld [vmem:[%s2917_s1 + $0x208] sm:$0xff] }
  0x13   :  { %816 = vmatprep.subr.bf16.mxu0 %v1821_v36  ;;  %869 = vmatprep.subr.bf16.mxu1 %v1823_v37  ;;  %v88_v0 = vld [vmem:[%s2917_s1 + $0x220] sm:$0xff]  ;;  %v89_v2 = vld [vmem:[%s2917_s1 + $0x228] sm:$0xff] }
  0x14   :  { %840 = vmatprep.mubr.bf16.mxu0 %v2373_v56  ;;  %893 = vmatprep.mubr.bf16.mxu1 %v2373_v56  ;;  %v1853_v5 = vcombine.high %v84_v63, %v88_v0  ;;  %v1855_v6 = vcombine.high %v85_v1, %v89_v2  ;;  %v92_v7 = vld [vmem:[%s2917_s1 + $0x240] sm:$0xff]  ;;  %v93_v9 = vld [vmem:[%s2917_s1 + $0x248] sm:$0xff]  ;;  %v1852_v11 = vcombine.low %v84_v63, %v88_v0 }
  0x15   :  { %v96_v8 = vld [vmem:[%s2917_s1 + $0x260] sm:$0xff]  ;;  %v97_v10 = vld [vmem:[%s2917_s1 + $0x268] sm:$0xff]  ;;  %v1854_v12 = vcombine.low %v85_v1, %v89_v2  ;;  %v23_v1 = vld [vmem:[%s2917_s1 + $0x18] sm:$0xff] }
  0x16   :  { %817 = vmatpush1.bf16.msra.mxu0 %v1820_v42  ;;  %870 = vmatpush1.bf16.msra.mxu1 %v1822_v43  ;;  %v1861_v13 = vcombine.high %v92_v7, %v96_v8  ;;  %v1863_v14 = vcombine.high %v93_v9, %v97_v10  ;;  %v100_v15 = vld [vmem:[%s2917_s1 + $0x280] sm:$0xff]  ;;  %v101_v17 = vld [vmem:[%s2917_s1 + $0x288] sm:$0xff]  ;;  %v1860_v19 = vcombine.low %v92_v7, %v96_v8  ;;  %v27_v2 = vld [vmem:[%s2917_s1 + $0x38] sm:$0xff] }
  0x17   :  { %818 = vmatprep.subr.bf16.mxu0 %v1829_v44  ;;  %871 = vmatprep.subr.bf16.mxu1 %v1831_v45  ;;  %v104_v16 = vld [vmem:[%s2917_s1 + $0x2a0] sm:$0xff]  ;;  %v105_v18 = vld [vmem:[%s2917_s1 + $0x2a8] sm:$0xff]  ;;  %v1862_v20 = vcombine.low %v93_v9, %v97_v10  ;;  %v31_v10 = vld [vmem:[%s2917_s1 + $0x58] sm:$0xff] }
  0x18   :  { %v1869_v21 = vcombine.high %v100_v15, %v104_v16  ;;  %v1871_v22 = vcombine.high %v101_v17, %v105_v18  ;;  %v108_v23 = vld [vmem:[%s2917_s1 + $0x2c0] sm:$0xff]  ;;  %v109_v25 = vld [vmem:[%s2917_s1 + $0x2c8] sm:$0xff]  ;;  %v1868_v27 = vcombine.low %v100_v15, %v104_v16  ;;  %v1870_v28 = vcombine.low %v101_v17, %v105_v18  ;;  %v42_v15 = vld [vmem:[%s2917_s1 + $0xb0] sm:$0xff] }
  0x19   :  { %v112_v24 = vld [vmem:[%s2917_s1 + $0x2e0] sm:$0xff]  ;;  %v113_v26 = vld [vmem:[%s2917_s1 + $0x2e8] sm:$0xff]  ;;  %v2517_v16 = vld [vmem:[%s2916_s0 + $0x14] ss:$8 sps:$4 sm:$0xff]   ;;  %v1794_v17 = vcombine.low %v23_v1, %v27_v2 }
  0x1a   :  { %819 = vmatpush1.bf16.msra.mxu0 %v1828_v50  ;;  %872 = vmatpush1.bf16.msra.mxu1 %v1830_v51  ;;  %v1877_v29 = vcombine.high %v108_v23, %v112_v24  ;;  %v1879_v30 = vcombine.high %v109_v25, %v113_v26  ;;  %v116_v31 = vld [vmem:[%s2917_s1 + $0x300] sm:$0xff]  ;;  %v117_v33 = vld [vmem:[%s2917_s1 + $0x308] sm:$0xff]  ;;  %v1876_v35 = vcombine.low %v108_v23, %v112_v24  ;;  %v46_v23 = vld [vmem:[%s2917_s1 + $0xd0] sm:$0xff] }
  0x1b   :  { %820 = vmatprep.subr.bf16.mxu0 %v1837_v52  ;;  %873 = vmatprep.subr.bf16.mxu1 %v1839_v53  ;;  %v120_v32 = vld [vmem:[%s2917_s1 + $0x320] sm:$0xff]  ;;  %v121_v34 = vld [vmem:[%s2917_s1 + $0x328] sm:$0xff]  ;;  %v1878_v38 = vcombine.low %v109_v25, %v113_v26  ;;  %v50_v24 = vld [vmem:[%s2917_s1 + $0xf0] sm:$0xff] }
  0x1c   :  { %v124_v36 = vld [vmem:[%s2917_s1 + $0x340] sm:$0xff]  ;;  %v1885_v39 = vcombine.high %v116_v31, %v120_v32  ;;  %v125_v40 = vld [vmem:[%s2917_s1 + $0x348] sm:$0xff]  ;;  %v1887_v42 = vcombine.high %v117_v33, %v121_v34  ;;  %v1884_v43 = vcombine.low %v116_v31, %v120_v32  ;;  %v1886_v46 = vcombine.low %v117_v33, %v121_v34  ;;  %v54_v32 = vld [vmem:[%s2917_s1 + $0x110] sm:$0xff] }
  0x1d   :  { %v128_v37 = vld [vmem:[%s2917_s1 + $0x360] sm:$0xff]  ;;  %v129_v41 = vld [vmem:[%s2917_s1 + $0x368] sm:$0xff]  ;;  %v58_v33 = vld [vmem:[%s2917_s1 + $0x130] sm:$0xff] }
  0x1e   :  { %821 = vmatpush1.bf16.msra.mxu0 %v1836_v59  ;;  %874 = vmatpush1.bf16.msra.mxu1 %v1838_v60  ;;  %v132_v44 = vld [vmem:[%s2917_s1 + $0x380] sm:$0xff]  ;;  %v1893_v47 = vcombine.high %v124_v36, %v128_v37  ;;  %v133_v48 = vld [vmem:[%s2917_s1 + $0x388] sm:$0xff]  ;;  %v1895_v50 = vcombine.high %v125_v40, %v129_v41  ;;  %v1892_v51 = vcombine.low %v124_v36, %v128_v37  ;;  %v55_v36 = vld [vmem:[%s2917_s1 + $0x118] sm:$0xff] }
  0x1f   :  { %822 = vmatprep.subr.bf16.mxu0 %v1845_v61  ;;  %875 = vmatprep.subr.bf16.mxu1 %v1847_v62  ;;  %v136_v45 = vld [vmem:[%s2917_s1 + $0x3a0] sm:$0xff]  ;;  %v137_v49 = vld [vmem:[%s2917_s1 + $0x3a8] sm:$0xff]  ;;  %v1894_v54 = vcombine.low %v125_v40, %v129_v41  ;;  %v22_v61 = vld [vmem:[%s2917_s1 + $0x10] sm:$0xff] }
  0x20   :  { %v140_v52 = vld [vmem:[%s2917_s1 + $0x3c0] sm:$0xff]  ;;  %v1901_v55 = vcombine.high %v132_v44, %v136_v45  ;;  %v141_v57 = vld [vmem:[%s2917_s1 + $0x3c8] sm:$0xff]  ;;  %v1903_v59 = vcombine.high %v133_v48, %v137_v49  ;;  %v1900_v60 = vcombine.low %v132_v44, %v136_v45  ;;  %v26_v62 = vld [vmem:[%s2917_s1 + $0x30] sm:$0xff]  ;;  %v1902_v63 = vcombine.low %v133_v48, %v137_v49 }
  0x21   :  { %v144_v53 = vld [vmem:[%s2917_s1 + $0x3e0] sm:$0xff]  ;;  %v145_v58 = vld [vmem:[%s2917_s1 + $0x3e8] sm:$0xff]  ;;  %v1793_v9 = vcombine.high %v22_v61, %v26_v62  ;;  %v59_v37 = vld [vmem:[%s2917_s1 + $0x138] sm:$0xff] }
  0x22   :  { %823 = vmatpush1.bf16.msra.mxu0 %v1844_v3  ;;  %876 = vmatpush1.bf16.msra.mxu1 %v1846_v4  ;;  %v1909_v0 = vcombine.high %v140_v52, %v144_v53  ;;  %v1911_v3 = vcombine.high %v141_v57, %v145_v58  ;;  %v1908_v4 = vcombine.low %v140_v52, %v144_v53  ;;  %v2500_v8 = vld [vmem:[%s2916_s0] ss:$8 sps:$4 sm:$0xff]   ;;  %v62_v40 = vld [vmem:[%s2917_s1 + $0x150] sm:$0xff]  ;;  %v63_v44 = vld [vmem:[%s2917_s1 + $0x158] sm:$0xff] }
  0x23   :  { %824 = vmatprep.subr.bf16.mxu0 %v1853_v5  ;;  %877 = vmatprep.subr.bf16.mxu1 %v1855_v6  ;;  %v30_v5 = vld [vmem:[%s2917_s1 + $0x50] sm:$0xff]  ;;  %v1910_v7 = vcombine.low %v141_v57, %v145_v58  ;;  %v67_v45 = vld [vmem:[%s2917_s1 + $0x178] sm:$0xff] }
  0x24   :  { %v34_v6 = vld [vmem:[%s2917_s1 + $0x70] sm:$0xff]  ;;  %v71_v52 = vld [vmem:[%s2917_s1 + $0x198] sm:$0xff]  ;;  %v1835_v53 = vcombine.high %v63_v44, %v67_v45  ;;  %v1834_v58 = vcombine.low %v63_v44, %v67_v45 }
  0x25   :  { %v1801_v18 = vcombine.high %v30_v5, %v34_v6  ;;  %v66_v41 = vld [vmem:[%s2917_s1 + $0x170] sm:$0xff] }
  0x26   :  { %825 = vmatpush1.bf16.msra.mxu0 %v1852_v11  ;;  %878 = vmatpush1.bf16.msra.mxu1 %v1854_v12  ;;  %v35_v11 = vld [vmem:[%s2917_s1 + $0x78] sm:$0xff]  ;;  %v1795_v12 = vcombine.high %v23_v1, %v27_v2  ;;  %v70_v48 = vld [vmem:[%s2917_s1 + $0x190] sm:$0xff] }
  0x27   :  { %826 = vmatprep.subr.bf16.mxu0 %v1861_v13  ;;  %879 = vmatprep.subr.bf16.mxu1 %v1863_v14  ;;  %v1792_v13 = vcombine.low %v22_v61, %v26_v62  ;;  %v38_v14 = vld [vmem:[%s2917_s1 + $0x90] sm:$0xff]  ;;  %v1802_v25 = vcombine.low %v31_v10, %v35_v11  ;;  %v83_v61 = vld [vmem:[%s2917_s1 + $0x1f8] sm:$0xff] }
  0x28   :  { %v1809_v26 = vcombine.high %v38_v14, %v42_v15  ;;  %v1808_v31 = vcombine.low %v38_v14, %v42_v15  ;;  %v74_v49 = vld [vmem:[%s2917_s1 + $0x1b0] sm:$0xff] }
  0x29   :  { %v82_v57 = vld [vmem:[%s2917_s1 + $0x1f0] sm:$0xff] }
  0x2a   :  { %827 = vmatpush1.bf16.msra.mxu0 %v1860_v19  ;;  %880 = vmatpush1.bf16.msra.mxu1 %v1862_v20  ;;  %v39_v19 = vld [vmem:[%s2917_s1 + $0x98] sm:$0xff] }
  0x2b   :  { %828 = vmatprep.subr.bf16.mxu0 %v1869_v21  ;;  %881 = vmatprep.subr.bf16.mxu1 %v1871_v22  ;;  %v43_v20 = vld [vmem:[%s2917_s1 + $0xb8] sm:$0xff]  ;;  %v1803_v21 = vcombine.high %v31_v10, %v35_v11  ;;  %v1800_v22 = vcombine.low %v30_v5, %v34_v6 }
  0x2c   :  { %v1810_v34 = vcombine.low %v39_v19, %v43_v20 }
  0x2e   :  { %829 = vmatpush1.bf16.msra.mxu0 %v1868_v27  ;;  %882 = vmatpush1.bf16.msra.mxu1 %v1870_v28  ;;  %v47_v27 = vld [vmem:[%s2917_s1 + $0xd8] sm:$0xff] }
  0x2f   :  { %830 = vmatprep.subr.bf16.mxu0 %v1877_v29  ;;  %883 = vmatprep.subr.bf16.mxu1 %v1879_v30  ;;  %v51_v28 = vld [vmem:[%s2917_s1 + $0xf8] sm:$0xff]  ;;  %v1811_v30 = vcombine.high %v39_v19, %v43_v20 }
  0x30   :  { %v2542_v29 = vld [vmem:[%s2916_s0 + $0x10] ss:$8 sps:$4 sm:$0xff]  }
  0x32   :  { %831 = vmatpush1.bf16.msra.mxu0 %v1876_v35  ;;  %884 = vmatpush1.bf16.msra.mxu1 %v1878_v38  ;;  %v1817_v35 = vcombine.high %v46_v23, %v50_v24  ;;  %v1819_v38 = vcombine.high %v47_v27, %v51_v28 }
  0x33   :  { %832 = vmatprep.subr.bf16.mxu0 %v1885_v39  ;;  %885 = vmatprep.subr.bf16.mxu1 %v1887_v42  ;;  %v1816_v39 = vcombine.low %v46_v23, %v50_v24  ;;  %v1818_v42 = vcombine.low %v47_v27, %v51_v28 }
  0x36   :  { %833 = vmatpush1.bf16.msra.mxu0 %v1884_v43  ;;  %886 = vmatpush1.bf16.msra.mxu1 %v1886_v46  ;;  %v1825_v43 = vcombine.high %v54_v32, %v58_v33  ;;  %v1827_v46 = vcombine.high %v55_v36, %v59_v37 }
  0x37   :  { %834 = vmatprep.subr.bf16.mxu0 %v1893_v47  ;;  %887 = vmatprep.subr.bf16.mxu1 %v1895_v50  ;;  %v1824_v47 = vcombine.low %v54_v32, %v58_v33  ;;  %v1826_v50 = vcombine.low %v55_v36, %v59_v37 }
  0x3a   :  { %835 = vmatpush1.bf16.msra.mxu0 %v1892_v51  ;;  %888 = vmatpush1.bf16.msra.mxu1 %v1894_v54  ;;  %v1833_v51 = vcombine.high %v62_v40, %v66_v41  ;;  %v1832_v54 = vcombine.low %v62_v40, %v66_v41 }
  0x3b   :  { %836 = vmatprep.subr.bf16.mxu0 %v1901_v55  ;;  %889 = vmatprep.subr.bf16.mxu1 %v1903_v59  ;;  %v78_v55 = vld [vmem:[%s2917_s1 + $0x1d0] sm:$0xff]  ;;  %v1841_v59 = vcombine.high %v70_v48, %v74_v49 }
  0x3e   :  { %837 = vmatpush1.bf16.msra.mxu0 %v1900_v60  ;;  %890 = vmatpush1.bf16.msra.mxu1 %v1902_v63  ;;  %v79_v60 = vld [vmem:[%s2917_s1 + $0x1d8] sm:$0xff]  ;;  %v1840_v63 = vcombine.low %v70_v48, %v74_v49 }
  0x3f   :  { %838 = vmatprep.subr.bf16.mxu0 %v1909_v0  ;;  %891 = vmatprep.subr.bf16.mxu1 %v1911_v3 }
  0x42   :  { %839 = vmatpush1.bf16.msra.mxu0 %v1908_v4  ;;  %892 = vmatpush1.bf16.msra.mxu1 %v1910_v7 }
  0x43   :  { %914 = vmatprep.subr.bf16.mxu0 %v1793_v9  ;;  %967 = vmatprep.subr.bf16.mxu1 %v1795_v12 }
  0x45   :  { %841 = vmatmul.mubr.bf16.vlgmr.msra.gmra.mrb[0].mxu0 %v2500_v8  ;;  %894 = vmatmul.mubr.bf16.vlgmr.msra.gmra.mrb[0].mxu1 %v2500_v8 }
  0x46   :  { %915 = vmatpush1.bf16.msra.mxu0 %v1792_v13  ;;  %968 = vmatpush1.bf16.msra.mxu1 %v1794_v17 }
  0x47   :  { %916 = vmatprep.subr.bf16.mxu0 %v1801_v18  ;;  %969 = vmatprep.subr.bf16.mxu1 %v1803_v21 }
  0x48   :  { %850 = vmatprep.mubr.bf16.mxu0 %v2517_v16  ;;  %903 = vmatprep.mubr.bf16.mxu1 %v2517_v16 }
  0x4a   :  { %917 = vmatpush1.bf16.msra.mxu0 %v1800_v22  ;;  %970 = vmatpush1.bf16.msra.mxu1 %v1802_v25 }
  0x4b   :  { %918 = vmatprep.subr.bf16.mxu0 %v1809_v26  ;;  %971 = vmatprep.subr.bf16.mxu1 %v1811_v30 }
  0x4d   :  { %851 = vmatmul.mubr.bf16.gmra.mrb[4].mxu0 %v2542_v29  ;;  %904 = vmatmul.mubr.bf16.gmra.mrb[4].mxu1 %v2542_v29 }
  0x4e   :  { %919 = vmatpush1.bf16.msra.mxu0 %v1808_v31  ;;  %972 = vmatpush1.bf16.msra.mxu1 %v1810_v34 }
  0x4f   :  { %920 = vmatprep.subr.bf16.mxu0 %v1817_v35  ;;  %973 = vmatprep.subr.bf16.mxu1 %v1819_v38 }
  0x50   :  { %946 = vmatprep.mubr.bf16.mxu0 %v2373_v56  ;;  %999 = vmatprep.mubr.bf16.mxu1 %v2373_v56  ;;  %v75_v56 = vld [vmem:[%s2917_s1 + $0x1b8] sm:$0xff] }
  0x51   :  { %v1843_v62 = vcombine.high %v71_v52, %v75_v56 }
  0x52   :  { %921 = vmatpush1.bf16.msra.mxu0 %v1816_v39  ;;  %974 = vmatpush1.bf16.msra.mxu1 %v1818_v42 }
  0x53   :  { %922 = vmatprep.subr.bf16.mxu0 %v1825_v43  ;;  %975 = vmatprep.subr.bf16.mxu1 %v1827_v46 }
  0x56   :  { %923 = vmatpush1.bf16.msra.mxu0 %v1824_v47  ;;  %976 = vmatpush1.bf16.msra.mxu1 %v1826_v50 }
  0x57   :  { %924 = vmatprep.subr.bf16.mxu0 %v1833_v51  ;;  %977 = vmatprep.subr.bf16.mxu1 %v1835_v53 }
  0x5a   :  { %925 = vmatpush1.bf16.msra.mxu0 %v1832_v54 }
  0x5b   :  { %8 = vsyncpa [#allocation3], 0  ;;  %978 = vmatpush1.bf16.msra.mxu1 %v1834_v58  ;;  %926 = vmatprep.subr.bf16.mxu0 %v1841_v59  ;;  %v1842_v0 = vcombine.low %v71_v52, %v75_v56  ;;  %v1849_v1 = vcombine.high %v78_v55, %v82_v57  ;;  %v1851_v2 = vcombine.high %v79_v60, %v83_v61  ;;  %v86_v3 = vld [vmem:[%s2917_s1 + $0x210] sm:$0xff]  ;;  %v87_v5 = vld [vmem:[%s2917_s1 + $0x218] sm:$0xff] }
  0x5c   :  { %979 = vmatprep.subr.bf16.mxu1 %v1843_v62  ;;  %v90_v4 = vld [vmem:[%s2917_s1 + $0x230] sm:$0xff]  ;;  %v91_v6 = vld [vmem:[%s2917_s1 + $0x238] sm:$0xff]  ;;  %v1848_v7 = vcombine.low %v78_v55, %v82_v57  ;;  %v1850_v9 = vcombine.low %v79_v60, %v83_v61 }
  0x5d   :  { %v1857_v10 = vcombine.high %v86_v3, %v90_v4  ;;  %v1859_v11 = vcombine.high %v87_v5, %v91_v6  ;;  %v94_v12 = vld [vmem:[%s2917_s1 + $0x250] sm:$0xff]  ;;  %v95_v14 = vld [vmem:[%s2917_s1 + $0x258] sm:$0xff]  ;;  %v1856_v17 = vcombine.low %v86_v3, %v90_v4  ;;  %v1858_v18 = vcombine.low %v87_v5, %v91_v6 }
  0x5e   :  { %927 = vmatpush1.bf16.msra.mxu0 %v1840_v63  ;;  %v98_v13 = vld [vmem:[%s2917_s1 + $0x270] sm:$0xff]  ;;  %v99_v15 = vld [vmem:[%s2917_s1 + $0x278] sm:$0xff] }
  0x5f   :  { %980 = vmatpush1.bf16.msra.mxu1 %v1842_v0  ;;  %928 = vmatprep.subr.bf16.mxu0 %v1849_v1  ;;  %v1865_v19 = vcombine.high %v94_v12, %v98_v13  ;;  %v1867_v20 = vcombine.high %v95_v14, %v99_v15  ;;  %v102_v21 = vld [vmem:[%s2917_s1 + $0x290] sm:$0xff]  ;;  %v103_v23 = vld [vmem:[%s2917_s1 + $0x298] sm:$0xff]  ;;  %v1864_v25 = vcombine.low %v94_v12, %v98_v13  ;;  %v2176_v12 = vld [vmem:[%s2918_s2 + $0x8] sm:$0xff]  }
  0x60   :  { %981 = vmatprep.subr.bf16.mxu1 %v1851_v2  ;;  %v106_v22 = vld [vmem:[%s2917_s1 + $0x2b0] sm:$0xff]  ;;  %v107_v24 = vld [vmem:[%s2917_s1 + $0x2b8] sm:$0xff]  ;;  %v1866_v26 = vcombine.low %v95_v14, %v99_v15  ;;  %v2178_v13 = vld [vmem:[%s2918_s2 + $0x88] sm:$0xff]  }
  0x61   :  { %v1873_v27 = vcombine.high %v102_v21, %v106_v22  ;;  %v1875_v28 = vcombine.high %v103_v23, %v107_v24  ;;  %v110_v30 = vld [vmem:[%s2917_s1 + $0x2d0] sm:$0xff]  ;;  %v111_v32 = vld [vmem:[%s2917_s1 + $0x2d8] sm:$0xff]  ;;  %v1872_v34 = vcombine.low %v102_v21, %v106_v22  ;;  %v1874_v35 = vcombine.low %v103_v23, %v107_v24  ;;  %v2187_v23 = vld [vmem:[%s2918_s2 + $0x60] sm:$0xff]  }
  0x62   :  { %929 = vmatpush1.bf16.msra.mxu0 %v1848_v7  ;;  %v114_v31 = vld [vmem:[%s2917_s1 + $0x2f0] sm:$0xff]  ;;  %v115_v33 = vld [vmem:[%s2917_s1 + $0x2f8] sm:$0xff]  ;;  %v2189_v24 = vld [vmem:[%s2918_s2 + $0xe0] sm:$0xff]  }
  0x63   :  { %982 = vmatpush1.bf16.msra.mxu1 %v1850_v9  ;;  %930 = vmatprep.subr.bf16.mxu0 %v1857_v10  ;;  %v1881_v36 = vcombine.high %v110_v30, %v114_v31  ;;  %v1883_v37 = vcombine.high %v111_v32, %v115_v33  ;;  %v118_v38 = vld [vmem:[%s2917_s1 + $0x310] sm:$0xff]  ;;  %v119_v40 = vld [vmem:[%s2917_s1 + $0x318] sm:$0xff]  ;;  %v1880_v42 = vcombine.low %v110_v30, %v114_v31  ;;  %v2171_v9 = vld [vmem:[%s2918_s2 + $0x40] sm:$0xff]  }
  0x64   :  { %983 = vmatprep.subr.bf16.mxu1 %v1859_v11  ;;  %v122_v39 = vld [vmem:[%s2917_s1 + $0x330] sm:$0xff]  ;;  %v123_v41 = vld [vmem:[%s2917_s1 + $0x338] sm:$0xff]  ;;  %v1882_v43 = vcombine.low %v111_v32, %v115_v33  ;;  %v2172_v10 = vld [vmem:[%s2918_s2] sm:$0xff]  }
  0x65   :  { %v1889_v44 = vcombine.high %v118_v38, %v122_v39  ;;  %v1891_v45 = vcombine.high %v119_v40, %v123_v41  ;;  %v126_v46 = vld [vmem:[%s2917_s1 + $0x350] sm:$0xff]  ;;  %v127_v48 = vld [vmem:[%s2917_s1 + $0x358] sm:$0xff]  ;;  %v1888_v50 = vcombine.low %v118_v38, %v122_v39  ;;  %v1890_v51 = vcombine.low %v119_v40, %v123_v41  ;;  %v2177_v11 = vld [vmem:[%s2918_s2 + $0xc8] sm:$0xff]  }
  0x66   :  { %931 = vmatpush1.bf16.msra.mxu0 %v1856_v17  ;;  %v130_v47 = vld [vmem:[%s2917_s1 + $0x370] sm:$0xff]  ;;  %v131_v49 = vld [vmem:[%s2917_s1 + $0x378] sm:$0xff]  ;;  %v2193_v30 = vld [vmem:[%s2918_s2 + $0xe8] sm:$0xff]  }
  0x67   :  { %984 = vmatpush1.bf16.msra.mxu1 %v1858_v18  ;;  %932 = vmatprep.subr.bf16.mxu0 %v1865_v19  ;;  %v1897_v52 = vcombine.high %v126_v46, %v130_v47  ;;  %v1899_v56 = vcombine.high %v127_v48, %v131_v49  ;;  %v134_v53 = vld [vmem:[%s2917_s1 + $0x390] sm:$0xff]  ;;  %v135_v55 = vld [vmem:[%s2917_s1 + $0x398] sm:$0xff]  ;;  %v1896_v58 = vcombine.low %v126_v46, %v130_v47  ;;  %v2194_v31 = vld [vmem:[%s2918_s2 + $0xa8] sm:$0xff]  }
  0x68   :  { %985 = vmatprep.subr.bf16.mxu1 %v1867_v20  ;;  %v138_v54 = vld [vmem:[%s2917_s1 + $0x3b0] sm:$0xff]  ;;  %v139_v57 = vld [vmem:[%s2917_s1 + $0x3b8] sm:$0xff]  ;;  %v1898_v59 = vcombine.low %v127_v48, %v131_v49  ;;  %v2203_v40 = vld [vmem:[%s2918_s2 + $0x1c0] sm:$0xff]  }
  0x69   :  { %v1905_v60 = vcombine.high %v134_v53, %v138_v54  ;;  %v1907_v61 = vcombine.high %v135_v55, %v139_v57  ;;  %v142_v62 = vld [vmem:[%s2917_s1 + $0x3d0] sm:$0xff]  ;;  %v143_v0 = vld [vmem:[%s2917_s1 + $0x3d8] sm:$0xff]  ;;  %v1904_v2 = vcombine.low %v134_v53, %v138_v54  ;;  %v1906_v3 = vcombine.low %v135_v55, %v139_v57  ;;  %v2205_v41 = vld [vmem:[%s2918_s2 + $0x140] sm:$0xff]  }
  0x6a   :  { %933 = vmatpush1.bf16.msra.mxu0 %v1864_v25  ;;  %v146_v63 = vld [vmem:[%s2917_s1 + $0x3f0] sm:$0xff]  ;;  %v147_v1 = vld [vmem:[%s2917_s1 + $0x3f8] sm:$0xff]  ;;  %v2188_v25 = vld [vmem:[%s2918_s2 + $0x20] sm:$0xff]  }
  0x6b   :  { %986 = vmatpush1.bf16.msra.mxu1 %v1866_v26  ;;  %934 = vmatprep.subr.bf16.mxu0 %v1873_v27  ;;  %v1913_v4 = vcombine.high %v142_v62, %v146_v63  ;;  %v1915_v5 = vcombine.high %v143_v0, %v147_v1  ;;  %v1912_v6 = vcombine.low %v142_v62, %v146_v63  ;;  %v2179_v14 = vld [vmem:[%s2918_s2 + $0x50] sm:$0xff]   ;;  %v2183_v19 = vld [vmem:[%s2918_s2 + $0x58] sm:$0xff]   ;;  %v2190_v26 = vld [vmem:[%s2918_s2 + $0xa0] sm:$0xff]  }
  0x6c   :  { %987 = vmatprep.subr.bf16.mxu1 %v1875_v28  ;;  %v1914_v7 = vcombine.low %v143_v0, %v147_v1  ;;  %v2181_v15 = vld [vmem:[%s2918_s2 + $0xd0] sm:$0xff]   ;;  %v2185_v20 = vld [vmem:[%s2918_s2 + $0xd8] sm:$0xff]   ;;  %v2191_v27 = vld [vmem:[%s2918_s2 + $0x68] sm:$0xff]  }
  0x6d   :  { %v2180_v17 = vld [vmem:[%s2918_s2 + $0x10] sm:$0xff]   ;;  %v2184_v21 = vld [vmem:[%s2918_s2 + $0x18] sm:$0xff]   ;;  %v2192_v28 = vld [vmem:[%s2918_s2 + $0x28] sm:$0xff]  }
  0x6e   :  { %935 = vmatpush1.bf16.msra.mxu0 %v1872_v34  ;;  %v2182_v18 = vld [vmem:[%s2918_s2 + $0x90] sm:$0xff]   ;;  %v2186_v22 = vld [vmem:[%s2918_s2 + $0x98] sm:$0xff]  }
  0x6f   :  { %988 = vmatpush1.bf16.msra.mxu1 %v1874_v35  ;;  %936 = vmatprep.subr.bf16.mxu0 %v1881_v36  ;;  %v2195_v32 = vld [vmem:[%s2918_s2 + $0x70] sm:$0xff]   ;;  %v2199_v36 = vld [vmem:[%s2918_s2 + $0x78] sm:$0xff]  }
  0x70   :  { %989 = vmatprep.subr.bf16.mxu1 %v1883_v37  ;;  %v2196_v33 = vld [vmem:[%s2918_s2 + $0x30] sm:$0xff]   ;;  %v2200_v37 = vld [vmem:[%s2918_s2 + $0x38] sm:$0xff]  }
  0x71   :  { %v2197_v34 = vld [vmem:[%s2918_s2 + $0xf0] sm:$0xff]   ;;  %v2201_v38 = vld [vmem:[%s2918_s2 + $0xf8] sm:$0xff]  }
  0x72   :  { %937 = vmatpush1.bf16.msra.mxu0 %v1880_v42  ;;  %v2198_v35 = vld [vmem:[%s2918_s2 + $0xb0] sm:$0xff]   ;;  %v2202_v39 = vld [vmem:[%s2918_s2 + $0xb8] sm:$0xff]  }
  0x73   :  { %990 = vmatpush1.bf16.msra.mxu1 %v1882_v43  ;;  %938 = vmatprep.subr.bf16.mxu0 %v1889_v44 }
  0x74   :  { %991 = vmatprep.subr.bf16.mxu1 %v1891_v45 }
  0x76   :  { %939 = vmatpush1.bf16.msra.mxu0 %v1888_v50 }
  0x77   :  { %992 = vmatpush1.bf16.msra.mxu1 %v1890_v51  ;;  %940 = vmatprep.subr.bf16.mxu0 %v1897_v52 }
  0x78   :  { %993 = vmatprep.subr.bf16.mxu1 %v1899_v56 }
  0x7a   :  { %941 = vmatpush1.bf16.msra.mxu0 %v1896_v58 }
  0x7b   :  { %994 = vmatpush1.bf16.msra.mxu1 %v1898_v59  ;;  %942 = vmatprep.subr.bf16.mxu0 %v1905_v60 }
  0x7c   :  { %995 = vmatprep.subr.bf16.mxu1 %v1907_v61 }
  0x7e   :  { %943 = vmatpush1.bf16.msra.mxu0 %v1904_v2 }
  0x7f   :  { %996 = vmatpush1.bf16.msra.mxu1 %v1906_v3  ;;  %944 = vmatprep.subr.bf16.mxu0 %v1913_v4 }
  0x80   :  { %997 = vmatprep.subr.bf16.mxu1 %v1915_v5 }
  0x82   :  { %945 = vmatpush1.bf16.msra.mxu0 %v1912_v6 }
  0x83   :  { %998 = vmatpush1.bf16.msra.mxu1 %v1914_v7 }
  0x84   :  { %2098 = vmatprep.subr.bf16.mxu1 %v2171_v9 }
  0x85   :  { %947 = vmatmul.mubr.bf16.vlgmr.msra.gmra.mrb[8].mxu0 %v2500_v8 }
  0x86   :  { %1000 = vmatmul.mubr.bf16.vlgmr.msra.gmra.mrb[8].mxu1 %v2500_v8  ;;  %956 = vmatprep.mubr.bf16.mxu0 %v2517_v16  ;;  %v2173_v8 = vld [vmem:[%s2918_s2 + $0xc0] sm:$0xff]  }
  0x87   :  { %1009 = vmatprep.mubr.bf16.mxu1 %v2517_v16  ;;  %v2174_v16 = vld [vmem:[%s2918_s2 + $0x80] sm:$0xff]   ;;  %2076 = vmatprep.subr.bf16.mxu0 %v2173_v8 }
  0x88   :  { %2099 = vmatpush3.bf16.msra.mxu1 %v2172_v10  ;;  %2077 = vmatpush3.bf16.msra.mxu0 %v2174_v16 }
  0x89   :  { %2078 = vmatprep.subr.bf16.mxu0 %v2177_v11 }
  0x8c   :  { %2079 = vmatpush3.bf16.msra.mxu0 %v2178_v13 }
  0x8d   :  { %957 = vmatmul.mubr.bf16.gmra.mrb[12].mxu0 %v2542_v29  ;;  %2080 = vmatprep.subr.bf16.mxu0 %v2181_v15 }
  0x8e   :  { %1010 = vmatmul.mubr.bf16.gmra.mrb[12].mxu1 %v2542_v29  ;;  %v2175_v29 = vld [vmem:[%s2918_s2 + $0x48] sm:$0xff]  }
  0x8f   :  { %2100 = vmatprep.subr.bf16.mxu1 %v2175_v29 }
  0x90   :  { %2101 = vmatpush3.bf16.msra.mxu1 %v2176_v12  ;;  %2081 = vmatpush3.bf16.msra.mxu0 %v2182_v18 }
  0x91   :  { %2102 = vmatprep.subr.bf16.mxu1 %v2179_v14  ;;  %2082 = vmatprep.subr.bf16.mxu0 %v2185_v20 }
  0x94   :  { %2103 = vmatpush3.bf16.msra.mxu1 %v2180_v17  ;;  %2083 = vmatpush3.bf16.msra.mxu0 %v2186_v22 }
  0x95   :  { %2104 = vmatprep.subr.bf16.mxu1 %v2183_v19  ;;  %2084 = vmatprep.subr.bf16.mxu0 %v2189_v24 }
  0x98   :  { %2105 = vmatpush3.bf16.msra.mxu1 %v2184_v21  ;;  %2085 = vmatpush3.bf16.msra.mxu0 %v2190_v26 }
  0x99   :  { %2106 = vmatprep.subr.bf16.mxu1 %v2187_v23  ;;  %2086 = vmatprep.subr.bf16.mxu0 %v2193_v30 }
  0x9c   :  { %2107 = vmatpush3.bf16.msra.mxu1 %v2188_v25  ;;  %2087 = vmatpush3.bf16.msra.mxu0 %v2194_v31 }
  0x9d   :  { %2108 = vmatprep.subr.bf16.mxu1 %v2191_v27  ;;  %2088 = vmatprep.subr.bf16.mxu0 %v2197_v34 }
  0xa0   :  { %2109 = vmatpush3.bf16.msra.mxu1 %v2192_v28  ;;  %2089 = vmatpush3.bf16.msra.mxu0 %v2198_v35 }
  0xa1   :  { %2110 = vmatprep.subr.bf16.mxu1 %v2195_v32  ;;  %2090 = vmatprep.subr.bf16.mxu0 %v2201_v38 }
  0xa4   :  { %2111 = vmatpush3.bf16.msra.mxu1 %v2196_v33  ;;  %2091 = vmatpush3.bf16.msra.mxu0 %v2202_v39 }
  0xa5   :  { %2112 = vmatprep.subr.bf16.mxu1 %v2199_v36  ;;  %2120 = vmatprep.subr.bf16.mxu0 %v2205_v41 }
  0xa8   :  { %2113 = vmatpush3.bf16.msra.mxu1 %v2200_v37 }
  0xa9   :  { %2142 = vmatprep.subr.bf16.mxu1 %v2203_v40 }
 0x118   :  { %v842_v42 = vpop.f32.mrb[0].mxu0  ;;  %v895_v44 = vpop.f32.mrb[0].mxu1 }
 0x119   :  { %v1020_v43 = vmax.f32 %v842_v42, 0.0  ;;  %v844_v45 = vpop.f32.mrb[1].mxu0  ;;  %v1022_v46 = vmax.f32 %v895_v44, 0.0  ;;  %v897_v47 = vpop.f32.mrb[1].mxu1 }
 0x11a   :  { %v846_v48 = vpop.f32.mrb[2].mxu0  ;;  %v899_v50 = vpop.f32.mrb[2].mxu1  ;;  %v1021_v52 = vmax.f32 %v844_v45, 0.0  ;;  %v1023_v55 = vmax.f32 %v897_v47, 0.0 }
 0x11b   :  { %v1028_v49 = vmax.f32 %v846_v48, 0.0  ;;  %v848_v51 = vpop.f32.mrb[3].mxu0  ;;  %v1030_v56 = vmax.f32 %v899_v50, 0.0  ;;  %v901_v54 = vpop.f32.mrb[3].mxu1 }
 0x11c   :  { %v1029_v53 = vmax.f32 %v848_v51, 0.0  ;;  %v1031_v58 = vmax.f32 %v901_v54, 0.0 }
 0x11d   :  { %v1052_v57 = vpack.c.bf16 %v1028_v49, %v1020_v43  ;;  %v1054_v59 = vpack.c.bf16 %v1030_v56, %v1022_v46 }
 0x11e   :  { %v1053_v60 = vpack.c.bf16 %v1029_v53, %v1021_v52  ;;  %v1055_v61 = vpack.c.bf16 %v1031_v58, %v1023_v55  ;;  %v2204_v55 = vld [vmem:[%s2918_s2 + $0x180] sm:$0xff]  }
 0x120   :  { %v852_v62 = vpop.f32.mrb[4].mxu0  ;;  %v905_v0 = vpop.f32.mrb[4].mxu1 }
 0x121   :  { %v1036_v63 = vmax.f32 %v852_v62, 0.0  ;;  %v854_v1 = vpop.f32.mrb[5].mxu0  ;;  %v1038_v2 = vmax.f32 %v905_v0, 0.0  ;;  %v907_v4 = vpop.f32.mrb[5].mxu1  ;;  %v2206_v0 = vld [vmem:[%s2918_s2 + $0x100] sm:$0xff]  }
 0x122   :  { %v1037_v3 = vmax.f32 %v854_v1, 0.0  ;;  %v856_v5 = vpop.f32.mrb[6].mxu0  ;;  %v1039_v6 = vmax.f32 %v907_v4, 0.0  ;;  %v909_v9 = vpop.f32.mrb[6].mxu1  ;;  %v2209_v4 = vld [vmem:[%s2918_s2 + $0x148] sm:$0xff]  }
 0x123   :  { %v1044_v7 = vmax.f32 %v856_v5, 0.0  ;;  %v858_v10 = vpop.f32.mrb[7].mxu0  ;;  %v1046_v8 = vmax.f32 %v909_v9, 0.0  ;;  %v911_v29 = vpop.f32.mrb[7].mxu1 }
 0x124   :  { %v1045_v16 = vmax.f32 %v858_v10, 0.0  ;;  %v1047_v12 = vmax.f32 %v911_v29, 0.0  ;;  %v2210_v29 = vld [vmem:[%s2918_s2 + $0x108] sm:$0xff]  }
 0x125   :  { %v2802_v11 = vpack.c.bf16 %v1044_v7, %v1036_v63  ;;  %v2804_v13 = vpack.c.bf16 %v1046_v8, %v1038_v2  ;;  %v2208_v7 = vld [vmem:[%s2918_s2 + $0x188] sm:$0xff]   ;;  %v2211_v8 = vld [vmem:[%s2918_s2 + $0x1d0] sm:$0xff]  }
 0x126   :  { %v2806_v14 = vpack.c.bf16 %v1045_v16, %v1037_v3  ;;  %v2808_v15 = vpack.c.bf16 %v1047_v12, %v1039_v6  ;;  %v2213_v12 = vld [vmem:[%s2918_s2 + $0x150] sm:$0xff]  }
 0x158   :  { %v948_v17 = vpop.f32.mrb[8].mxu0 }
 0x159   :  { %v1001_v18 = vpop.f32.mrb[8].mxu1  ;;  %v950_v19 = vpop.f32.mrb[9].mxu0  ;;  %v1024_v22 = vmax.f32 %v948_v17, 0.0 }
 0x15a   :  { %v1003_v20 = vpop.f32.mrb[9].mxu1  ;;  %v952_v21 = vpop.f32.mrb[10].mxu0  ;;  %v1026_v26 = vmax.f32 %v1001_v18, 0.0  ;;  %v1025_v27 = vmax.f32 %v950_v19, 0.0  ;;  %v2214_v18 = vld [vmem:[%s2918_s2 + $0x110] sm:$0xff]   ;;  %v2217_v19 = vld [vmem:[%s2918_s2 + $0x158] sm:$0xff]  }
 0x15b   :  { %v1032_v23 = vmax.f32 %v952_v21, 0.0  ;;  %v1005_v24 = vpop.f32.mrb[10].mxu1  ;;  %v954_v25 = vpop.f32.mrb[11].mxu0  ;;  %v1027_v32 = vmax.f32 %v1003_v20, 0.0  ;;  %v2216_v20 = vld [vmem:[%s2918_s2 + $0x198] sm:$0xff]   ;;  %v2219_v21 = vld [vmem:[%s2918_s2 + $0x1e0] sm:$0xff]  }
 0x15c   :  { %v1034_v28 = vmax.f32 %v1005_v24, 0.0  ;;  %v1033_v30 = vmax.f32 %v954_v25, 0.0  ;;  %v1007_v31 = vpop.f32.mrb[11].mxu1  ;;  %v2220_v24 = vld [vmem:[%s2918_s2 + $0x1a0] sm:$0xff]   ;;  %v2223_v25 = vld [vmem:[%s2918_s2 + $0x1e8] sm:$0xff]  }
 0x15d   :  { %v1056_v33 = vpack.c.bf16 %v1032_v23, %v1024_v22  ;;  %v1035_v34 = vmax.f32 %v1007_v31, 0.0  ;;  %v2218_v22 = vld [vmem:[%s2918_s2 + $0x118] sm:$0xff]   ;;  %v2221_v23 = vld [vmem:[%s2918_s2 + $0x160] sm:$0xff]   ;;  %v2226_v31 = vld [vmem:[%s2918_s2 + $0x128] sm:$0xff]  }
 0x15e   :  { %v1058_v35 = vpack.c.bf16 %v1034_v28, %v1026_v26  ;;  %v1057_v36 = vpack.c.bf16 %v1033_v30, %v1025_v27  ;;  %v2222_v26 = vld [vmem:[%s2918_s2 + $0x120] sm:$0xff]   ;;  %v2225_v27 = vld [vmem:[%s2918_s2 + $0x168] sm:$0xff]   ;;  %v2227_v30 = vld [vmem:[%s2918_s2 + $0x1f0] sm:$0xff]  }
 0x15f   :  { %v1068_v37 = vmax.bf16 %v1056_v33, %v1052_v57  ;;  %v1059_v38 = vpack.c.bf16 %v1035_v34, %v1027_v32  ;;  %v2224_v28 = vld [vmem:[%s2918_s2 + $0x1a8] sm:$0xff]   ;;  %v2229_v32 = vld [vmem:[%s2918_s2 + $0x170] sm:$0xff]   ;;  %v2231_v34 = vld [vmem:[%s2918_s2 + $0x1f8] sm:$0xff]  }
 0x160   :  { %v1070_v39 = vmax.bf16 %v1058_v35, %v1054_v59  ;;  %v1069_v40 = vmax.bf16 %v1057_v36, %v1053_v60  ;;  %v958_v41 = vpop.f32.mrb[12].mxu0  ;;  %v2207_v60 = vld [vmem:[%s2918_s2 + $0x1c8] sm:$0xff]   ;;  %v2228_v33 = vld [vmem:[%s2918_s2 + $0x1b0] sm:$0xff]   ;;  %v2233_v36 = vld [vmem:[%s2918_s2 + $0x178] sm:$0xff]  }
 0x161   :  { %v1071_v42 = vmax.bf16 %v1059_v38, %v1055_v61  ;;  %v1040_v43 = vmax.f32 %v958_v41, 0.0  ;;  %v1011_v44 = vpop.f32.mrb[12].mxu1  ;;  %v960_v45 = vpop.f32.mrb[13].mxu0  ;;  %v2230_v35 = vld [vmem:[%s2918_s2 + $0x130] sm:$0xff]   ;;  %v2234_v38 = vld [vmem:[%s2918_s2 + $0x138] sm:$0xff]  }
 0x162   :  { %v1076_v46 = vmax.bf16 %v1070_v39, %v1068_v37  ;;  %v1042_v47 = vmax.f32 %v1011_v44, 0.0  ;;  %v1041_v48 = vmax.f32 %v960_v45, 0.0  ;;  %v1013_v49 = vpop.f32.mrb[13].mxu1  ;;  %v962_v50 = vpop.f32.mrb[14].mxu0  ;;  %v2232_v37 = vld [vmem:[%s2918_s2 + $0x1b8] sm:$0xff]  }
 0x163   :  { %v1043_v51 = vmax.f32 %v1013_v49, 0.0  ;;  %v1048_v52 = vmax.f32 %v962_v50, 0.0  ;;  %v1015_v56 = vpop.f32.mrb[14].mxu1  ;;  %v964_v53 = vpop.f32.mrb[15].mxu0  ;;  %v1077_v54 = vmax.bf16 %v1071_v42, %v1069_v40 }
 0x164   :  { %v1050_v57 = vmax.f32 %v1015_v56, 0.0  ;;  %v1049_v58 = vmax.f32 %v964_v53, 0.0  ;;  %v1017_v59 = vpop.f32.mrb[15].mxu1  ;;  %v1147_v1 = vrot.slane %v1076_v46, 4 }
 0x165   :  { %v1064_v61 = vpack.c.bf16 %v1048_v52, %v1040_v43  ;;  %v1051_v62 = vmax.f32 %v1017_v59, 0.0  ;;  %1415 = vmatprep.mubr.bf16.mxu1 %v1077_v54  ;;  %v1148_v63 = vrot.slane %v1077_v54, 4 }
 0x166   :  { %v1066_v2 = vpack.c.bf16 %v1050_v57, %v1042_v47  ;;  %v1065_v3 = vpack.c.bf16 %v1049_v58, %v1041_v48  ;;  %1416 = vmatmul.mubr.bf16.vlgmr.msra.gmra.mrb[16].mxu1 %v1076_v46 }
 0x167   :  { %v1072_v5 = vmax.bf16 %v1064_v61, %v2802_v11  ;;  %v1067_v6 = vpack.c.bf16 %v1051_v62, %v1043_v51  ;;  %2143 = vmatpush3.bf16.msra.mxu1 %v2204_v55  ;;  %1279 = vmatprep.mubr.bf16.mxu0 %v1148_v63 }
 0x168   :  { %v1074_v9 = vmax.bf16 %v1066_v2, %v2804_v13  ;;  %v1073_v10 = vmax.bf16 %v1065_v3, %v2806_v14  ;;  %1280 = vmatmul.mubr.bf16.vlgmr.msra.gmra.mrb[16].mxu0 %v1147_v1  ;;  %2144 = vmatprep.subr.bf16.mxu1 %v2207_v60  ;;  %v2212_v14 = vld [vmem:[%s2918_s2 + $0x190] sm:$0xff]  }
 0x169   :  { %v1075_v16 = vmax.bf16 %v1067_v6, %v2808_v15  ;;  %2121 = vmatpush3.bf16.msra.mxu0 %v2206_v0  ;;  %v2215_v15 = vld [vmem:[%s2918_s2 + $0x1d8] sm:$0xff]   ;;  %s2259_s2 = smov [#allocation2]  }
 0x16a   :  { %v1078_v11 = vmax.bf16 %v1074_v9, %v1072_v5  ;;  %2122 = vmatprep.subr.bf16.mxu0 %v2209_v4  ;;  %s1776_s13 = sshll.u32 %s2259_s2, 4  ;;  %s1777_s13 = int_to_ptr.vmem [resolvable:$true] %s1776_s13 }
 0x16b   :  { %2145 = vmatpush3.bf16.msra.mxu1 %v2208_v7  ;;  %v1079_v13 = vmax.bf16 %v1075_v16, %v1073_v10  ;;  %s2235_s14 = scalar_lea.vmem %s1777_s13, 128  ;;  %p2240_p1 = scmp.lt.s32.totalorder %s1777_s13, %s1777_s13 }
 0x16c   :  { %2146 = vmatprep.subr.bf16.mxu1 %v2211_v8  ;;  %v1628_v39 = vrot.slane %v1078_v11, 4  ;;  %p2236_p0 = scmp.ne.s32.totalorder %s1777_s13, %s2235_s14  ;;  %p2241_p2 = scmp.lt.s32.totalorder %s2235_s14, %s2235_s14 }
 0x16d   :  { %2123 = vmatpush3.bf16.msra.mxu0 %v2210_v29  ;;  %1584 = vmatprep.mubr.bf16.mxu0 %v1079_v13  ;;  %v1629_v17 = vrot.slane %v1079_v13, 4 }
 0x16e   :  { %2124 = vmatprep.subr.bf16.mxu0 %v2213_v12  ;;  %p2242_p3 = por %p2241_p2, %p2240_p1 }
 0x16f   :  { %2147 = vmatpush3.bf16.msra.mxu1 %v2212_v14  ;;  %1760 = vmatprep.mubr.bf16.mxu1 %v1629_v17 }
 0x170   :  { %2148 = vmatprep.subr.bf16.mxu1 %v2215_v15  ;;  %p2243_p4 = pnand %p2242_p3, %p2236_p0 }
 0x171   :  { %2125 = vmatpush3.bf16.msra.mxu0 %v2214_v18 }
 0x172   :  { %2126 = vmatprep.subr.bf16.mxu0 %v2217_v19 }
 0x173   :  { %2149 = vmatpush3.bf16.msra.mxu1 %v2216_v20 }
 0x174   :  { %2150 = vmatprep.subr.bf16.mxu1 %v2219_v21 }
 0x175   :  { %2127 = vmatpush3.bf16.msra.mxu0 %v2218_v22 }
 0x176   :  { %2128 = vmatprep.subr.bf16.mxu0 %v2221_v23 }
 0x177   :  { %2151 = vmatpush3.bf16.msra.mxu1 %v2220_v24 }
 0x178   :  { %2152 = vmatprep.subr.bf16.mxu1 %v2223_v25 }
 0x179   :  { %2129 = vmatpush3.bf16.msra.mxu0 %v2222_v26 }
 0x17a   :  { %2130 = vmatprep.subr.bf16.mxu0 %v2225_v27 }
 0x17b   :  { %2153 = vmatpush3.bf16.msra.mxu1 %v2224_v28 }
 0x17c   :  { %2154 = vmatprep.subr.bf16.mxu1 %v2227_v30 }
 0x17d   :  { %2131 = vmatpush3.bf16.msra.mxu0 %v2226_v31 }
 0x17e   :  { %2132 = vmatprep.subr.bf16.mxu0 %v2229_v32 }
 0x17f   :  { %2155 = vmatpush3.bf16.msra.mxu1 %v2228_v33 }
 0x180   :  { %2156 = vmatprep.subr.bf16.mxu1 %v2231_v34 }
 0x181   :  { %2133 = vmatpush3.bf16.msra.mxu0 %v2230_v35 }
 0x182   :  { %2134 = vmatprep.subr.bf16.mxu0 %v2233_v36 }
 0x183   :  { %2157 = vmatpush3.bf16.msra.mxu1 %v2232_v37 }
 0x185   :  { %2135 = vmatpush3.bf16.msra.mxu0 %v2234_v38 }
 0x186   :  { %1761 = vmatmul.mubr.bf16.vlgmr.msra.gmra.mrb[20].mxu1 %v1628_v39 }
 0x188   :  { %1585 = vmatmul.mubr.bf16.vlgmr.msra.gmra.mrb[20].mxu0 %v1078_v11 }
 0x239   :  { %v2114_v40 = vpop.f32.mrb[16].mxu1 }
 0x23a   :  { %v2115_v41 = vpop.f32.mrb[17].mxu1 }
 0x23b   :  { %v2116_v42 = vadd.f32 %v2115_v41, %v2114_v40  ;;  %v2092_v43 = vpop.f32.mrb[16].mxu0  ;;  %v2117_v44 = vpop.f32.mrb[18].mxu1 }
 0x23c   :  { %v2093_v45 = vpop.f32.mrb[17].mxu0  ;;  %v2118_v46 = vpop.f32.mrb[19].mxu1 }
 0x23d   :  { %v2094_v47 = vadd.f32 %v2093_v45, %v2092_v43  ;;  %v2095_v48 = vpop.f32.mrb[18].mxu0 }
 0x23e   :  { %v2096_v49 = vpop.f32.mrb[19].mxu0 }
 0x23f   :  { %v1418_v50 = vadd.f32 %v2116_v42, %v2094_v47 }
 0x259   :  { %v2158_v51 = vpop.f32.mrb[20].mxu1 }
 0x25a   :  { %v2159_v52 = vpop.f32.mrb[21].mxu1 }
 0x25b   :  { %v2160_v56 = vadd.f32 %v2159_v52, %v2158_v51  ;;  %v2136_v53 = vpop.f32.mrb[20].mxu0  ;;  %v2161_v54 = vpop.f32.mrb[22].mxu1 }
 0x25c   :  { %v2137_v55 = vpop.f32.mrb[21].mxu0  ;;  %v2162_v57 = vpop.f32.mrb[23].mxu1 }
 0x25d   :  { %v2138_v58 = vadd.f32 %v2137_v55, %v2136_v53  ;;  %v2139_v59 = vpop.f32.mrb[22].mxu0 }
 0x25e   :  { %v2140_v60 = vpop.f32.mrb[23].mxu0 }
 0x25f   :  { %v1592_v61 = vadd.f32 %v2138_v58, %v1418_v50 }
 0x261   :  { %v1768_v62 = vadd.f32 %v2160_v56, %v1592_v61 }
 0x263   :  { %1769 = vst [vmem:[#allocation2] sm:$0xff] %v1768_v62 }
 0x264   :  { %2246 = shalt.err (!%p2243_p4)
}
 0x265   :  { %s2247_s17 = scalar_lea.hbm %s2919_s3, 128 }
 0x266   :  { %p2248_p5 = scmp.ne.s32.totalorder %s2919_s3, %s2247_s17  ;;  %p2251_p6 = scmp.lt.u32.totalorder %s2247_s17, %s2919_s3 }
 0x268   :  { %p2253_p7 = pnand %p2251_p6, %p2248_p5 }
 0x26a   :  { %2256 = shalt.err (!%p2253_p7)
}
 0x26b   :  { %1779 = dma.vmem_to_hbm [thread:$0]  %s1777_s13, 128, %s2919_s3, [#allocation3]  }
 0x26c   :  { %2257 = dma.done.wait [#allocation3], 128  }
 0x26d   :  { %2258 = vsyncadd [#allocation3], 4294967168 }
 0x26e   :  { %1783 = vsyncpa [#allocation3], 1 }

</bundles_post_ra>
